<compile_context>
chip_gen: v5e
topology: v5e:2x2
jax: 0.10.0
libtpu: 0.0.40
codegen_flags: <defaults>
</compile_context>

<pallas_src>
import functools

import jax
import jax.numpy as jnp
from jax.experimental import pallas as pl
from jax.experimental.pallas import tpu as pltpu

EPS = 1e-5
_ONEPASS_VMEM_BUDGET = 28 << 20   # I/O double-buffers + f32 temps must fit here
_ONEPASS_VMEM_LIMIT = 48 << 20    # scoped-VMEM limit requested for the fused path
_TWOPASS_BLOCK_BYTES = 1 << 20    # per-block budget for the pipelined fallback


# ----------------------------------------------------------------------------
# Fused single-pass kernel: one grid step owns a full (N, c_block, HW) slab.
# HBM traffic: 1 read + 1 write per tensor.
# ----------------------------------------------------------------------------
def _complex_bn_fused_kernel(xr_ref, xi_ref, affr_ref, affi_ref, or_ref, oi_ref,
                             *, eps, inv_count):
    def bn_one(x_ref, aff_ref, o_ref):
        x = x_ref[...].astype(jnp.float32)                   # (N, c_blk, HW)
        row = jnp.sum(x, axis=-1, keepdims=True)             # (N, c_blk, 1) lane reduce
        row_sq = jnp.sum(x * x, axis=-1, keepdims=True)
        s1 = jnp.sum(row, axis=0, keepdims=True)             # (1, c_blk, 1)
        s2 = jnp.sum(row_sq, axis=0, keepdims=True)
        mean = s1 * inv_count
        var = jnp.maximum(s2 * inv_count - mean * mean, 0.0)  # guard cancellation
        scale = jax.lax.rsqrt(var + eps) * aff_ref[0]          # gamma
        shift = aff_ref[1] - mean * scale                      # beta - mean*scale
        o_ref[...] = (x * scale + shift).astype(o_ref.dtype)

    bn_one(xr_ref, affr_ref, or_ref)
    bn_one(xi_ref, affi_ref, oi_ref)


# ----------------------------------------------------------------------------
# Two-pass pipelined kernel for shapes that do not fit VMEM.
# grid = (channel_tiles, pass, batch, hw_tiles); HBM traffic: 2 reads + 1 write.
# ----------------------------------------------------------------------------
def _complex_bn_twopass_kernel(xr_ref, xi_ref, affr_ref, affi_ref, or_ref, oi_ref,
                               stats_r, stats_i, *, eps, inv_count):
    p = pl.program_id(1)
    ni = pl.program_id(2)
    ti = pl.program_id(3)
    first_tile = jnp.logical_and(ni == 0, ti == 0)

    @pl.when(jnp.logical_and(p == 0, first_tile))
    def _init():
        stats_r[...] = jnp.zeros_like(stats_r)
        stats_i[...] = jnp.zeros_like(stats_i)

    @pl.when(p == 0)
    def _accumulate():
        xr = xr_ref[...].astype(jnp.float32)          # (c_block, hw_tile)
        xi = xi_ref[...].astype(jnp.float32)
        stats_r[0] += jnp.sum(xr, axis=-1, keepdims=True)
        stats_r[1] += jnp.sum(xr * xr, axis=-1, keepdims=True)
        stats_i[0] += jnp.sum(xi, axis=-1, keepdims=True)
        stats_i[1] += jnp.sum(xi * xi, axis=-1, keepdims=True)

    @pl.when(jnp.logical_and(p == 1, first_tile))
    def _finalize():
        # Convert (sum, sumsq) -> (scale, shift) in place, once per channel tile.
        for stats, aff in ((stats_r, affr_ref), (stats_i, affi_ref)):
            mean = stats[0] * inv_count
            var = jnp.maximum(stats[1] * inv_count - mean * mean, 0.0)
            scale = jax.lax.rsqrt(var + eps) * aff[0]  # gamma
            shift = aff[1] - mean * scale              # beta - mean*scale
            stats[0] = scale
            stats[1] = shift

    @pl.when(p == 1)
    def _normalize():
        xr = xr_ref[...].astype(jnp.float32)
        xi = xi_ref[...].astype(jnp.float32)
        or_ref[...] = (xr * stats_r[0] + stats_r[1]).astype(or_ref.dtype)
        oi_ref[...] = (xi * stats_i[0] + stats_i[1]).astype(oi_ref.dtype)


# ----------------------------------------------------------------------------
# Tiling heuristics
# ----------------------------------------------------------------------------
def _onepass_c_block(n, c, hw, itemsize):
    """Largest channel tile whose full (N, c_block, HW) slab fits VMEM, else None."""
    def fits(cb):
        elems = n * cb * hw
        # 2 in + 2 out tensors double-buffered, plus ~f32 temporaries for the math.
        need = 8 * elems * itemsize + 4 * elems * 4
        return need <= _ONEPASS_VMEM_BUDGET

    if c % 8 != 0:
        # Channel tile must equal full C to satisfy the (8,128) layout rule.
        return c if fits(c) else None
    candidates = [cb for cb in range(8, c + 1, 8) if c % cb == 0 and fits(cb)]
    if not candidates:
        return None
    # Prefer >=2 channel tiles so the "parallel" grid axis can feed both v7x cores.
    multi = [cb for cb in candidates if c // cb >= 2]
    return max(multi) if multi else max(candidates)


def _choose_tiles(c, hw, itemsize):
    """Pick (c_block, hw_tile) for the two-pass path, ~<=1 MiB per block."""
    c_block = c
    if c % 8 == 0 and c >= 16:
        c_block = 8
        while (c_block * 2) <= 64 and c % (c_block * 2) == 0:
            c_block *= 2
    max_elems = max(128, _TWOPASS_BLOCK_BYTES // (itemsize * c_block))
    if hw <= max_elems or hw % 128 != 0:
        # Small, or cannot tile cleanly -> use the full row.
        # TODO(synk): for huge HW not divisible by 128 this falls back to one
        # large block; pad HW upstream if that ever matters.
        return c_block, hw
    hw_tile = 128
    cand = 256
    while cand <= max_elems:
        if hw % cand == 0:
            hw_tile = cand
        cand += 128
    return c_block, hw_tile


# ----------------------------------------------------------------------------
# Wrapper
# ----------------------------------------------------------------------------
def naive_complex_batchnorm2d(input_r, input_i, params, eps=EPS, *,
                              force_two_pass=False):
    """Forward of NaiveComplexBatchNorm2d: independent BN on real & imag parts."""
    assert input_r.shape == input_i.shape
    n, c, h, w = input_r.shape
    hw = h * w

    # Free reshapes (no data movement): NCHW -> (N, C, H*W).
    xr = input_r.reshape(n, c, hw)
    xi = input_i.reshape(n, c, hw)
    aff_r = jnp.stack([params["gamma_r"], params["beta_r"]]
                      ).astype(jnp.float32).reshape(2, c, 1)
    aff_i = jnp.stack([params["gamma_i"], params["beta_i"]]
                      ).astype(jnp.float32).reshape(2, c, 1)

    inv_count = 1.0 / float(n * hw)
    itemsize = jnp.dtype(input_r.dtype).itemsize
    out_shapes = (jax.ShapeDtypeStruct((n, c, hw), input_r.dtype),
                  jax.ShapeDtypeStruct((n, c, hw), input_i.dtype))

    c_block = None if force_two_pass else _onepass_c_block(n, c, hw, itemsize)

    if c_block is not None:
        # --- Fused single-pass path: 1 read + 1 write of HBM per tensor. ---
        kernel = functools.partial(_complex_bn_fused_kernel,
                                   eps=eps, inv_count=inv_count)
        x_spec = pl.BlockSpec((n, c_block, hw), lambda ci: (0, ci, 0))
        aff_spec = pl.BlockSpec((2, c_block, 1), lambda ci: (0, ci, 0))
        out_r, out_i = pl.pallas_call(
            kernel,
            out_shape=out_shapes,
            grid_spec=pltpu.PrefetchScalarGridSpec(
                num_scalar_prefetch=0,
                grid=(c // c_block,),
                in_specs=[x_spec, x_spec, aff_spec, aff_spec],
                out_specs=[x_spec, x_spec],
            ),
            compiler_params=pltpu.CompilerParams(
                dimension_semantics=("parallel",),
                vmem_limit_bytes=_ONEPASS_VMEM_LIMIT,
            ),
        )(xr, xi, aff_r, aff_i)
    else:
        # --- Two-pass pipelined path for large activations. ---
        cb, hw_tile = _choose_tiles(c, hw, itemsize)
        kernel = functools.partial(_complex_bn_twopass_kernel,
                                   eps=eps, inv_count=inv_count)
        x_spec = pl.BlockSpec((None, cb, hw_tile),
                              lambda ci, p, ni, ti: (ni, ci, ti))
        aff_spec = pl.BlockSpec((2, cb, 1),
                                lambda ci, p, ni, ti: (0, ci, 0))
        # Stats pass (p == 0): output block index held constant -> never flushed.
        # Normalize pass (p == 1): sweep every block once and write it back.
        out_spec = pl.BlockSpec((None, cb, hw_tile),
                                lambda ci, p, ni, ti: (p * ni, ci, p * ti))
        out_r, out_i = pl.pallas_call(
            kernel,
            out_shape=out_shapes,
            grid_spec=pltpu.PrefetchScalarGridSpec(
                num_scalar_prefetch=0,
                grid=(c // cb, 2, n, hw // hw_tile),
                in_specs=[x_spec, x_spec, aff_spec, aff_spec],
                out_specs=[out_spec, out_spec],
                scratch_shapes=[pltpu.VMEM((2, cb, 1), jnp.float32),
                                pltpu.VMEM((2, cb, 1), jnp.float32)],
            ),
            compiler_params=pltpu.CompilerParams(
                dimension_semantics=("parallel", "arbitrary", "arbitrary",
                                     "arbitrary"),
            ),
        )(xr, xi, aff_r, aff_i)

    return out_r.reshape(n, c, h, w), out_i.reshape(n, c, h, w)


def init_params(num_features):
    # Deterministic, non-trivial affine parameters so the affine path is exercised.
    idx = jnp.arange(num_features, dtype=jnp.float32)
    return {
        "gamma_r": 1.0 + 0.1 * idx,
        "beta_r": 0.01 * idx,
        "gamma_i": 1.0 - 0.05 * idx,
        "beta_i": -0.02 * idx,
    }


def _reference_bn(x, gamma, beta, eps=EPS):
    mean = jnp.mean(x, axis=(0, 2, 3), keepdims=True)
    var = jnp.mean((x - mean) ** 2, axis=(0, 2, 3), keepdims=True)  # biased
    return (x - mean) / jnp.sqrt(var + eps) * gamma.reshape(1, -1, 1, 1) \
        + beta.reshape(1, -1, 1, 1)


if __name__ == "__main__":
    N, C, H, W = 2, 4, 16, 16  # NCHW, matching the PyTorch module's convention
    key = jax.random.PRNGKey(0)
    kr, ki = jax.random.split(key)
    x_r = jax.random.normal(kr, (N, C, H, W), dtype=jnp.float32) * 2.0 + 0.5
    x_i = jax.random.normal(ki, (N, C, H, W), dtype=jnp.float32) * 0.7 - 1.0

    params = init_params(C)

    ref_r = _reference_bn(x_r, params["gamma_r"], params["beta_r"])
    ref_i = _reference_bn(x_i, params["gamma_i"], params["beta_i"])

    # Fast fused single-pass path (used automatically for these shapes).
    out_r, out_i = naive_complex_batchnorm2d(x_r, x_i, params)
    out_r = jax.block_until_ready(out_r)
    out_i = jax.block_until_ready(out_i)
    assert out_r.shape == (N, C, H, W) and out_i.shape == (N, C, H, W)
    assert float(jnp.max(jnp.abs(out_r - ref_r))) < 1e-4
    assert float(jnp.max(jnp.abs(out_i - ref_i))) < 1e-4

    # Also exercise the large-shape two-pass pipeline path on the same inputs.
    out2_r, out2_i = naive_complex_batchnorm2d(x_r, x_i, params,
                                               force_two_pass=True)
    out2_r = jax.block_until_ready(out2_r)
    out2_i = jax.block_until_ready(out2_i)
    assert float(jnp.max(jnp.abs(out2_r - ref_r))) < 1e-4
    assert float(jnp.max(jnp.abs(out2_i - ref_i))) < 1e-4

    print("KERNEL_OK")
</pallas_src>

<mosaic_0001>
module attributes {stable_mosaic.version = 11 : i64} {
  func.func @_complex_bn_fused_kernel(%arg0: i32, %arg1: memref<2x4x256xf32, #tpu.memory_space<vmem>>, %arg2: memref<2x4x256xf32, #tpu.memory_space<vmem>>, %arg3: memref<2x4x1xf32, #tpu.memory_space<vmem>>, %arg4: memref<2x4x1xf32, #tpu.memory_space<vmem>>, %arg5: memref<2x4x256xf32, #tpu.memory_space<vmem>>, %arg6: memref<2x4x256xf32, #tpu.memory_space<vmem>>) attributes {dimension_semantics = [#tpu.dimension_semantics<parallel>], iteration_bounds = array<i64: 1>, scalar_prefetch = 0 : i64, scratch_operands = 0 : i64, tpu.core_type = #tpu.core_type<tc>, window_params = [{transform_indices = @transform_0, window_bounds = array<i64: 2, 4, 256>}, {transform_indices = @transform_1, window_bounds = array<i64: 2, 4, 256>}, {transform_indices = @transform_2, window_bounds = array<i64: 2, 4, 1>}, {transform_indices = @transform_3, window_bounds = array<i64: 2, 4, 1>}, {transform_indices = @transform_4, window_bounds = array<i64: 2, 4, 256>}, {transform_indices = @transform_5, window_bounds = array<i64: 2, 4, 256>}]} {
    %c0 = arith.constant 0 : index
    %c0_0 = arith.constant 0 : index
    %c0_1 = arith.constant 0 : index
    %0 = vector.load %arg1[%c0, %c0_0, %c0_1] : memref<2x4x256xf32, #tpu.memory_space<vmem>>, vector<2x4x256xf32>
    %cst = arith.constant dense<0.000000e+00> : vector<2x4xf32>
    %1 = vector.multi_reduction <add>, %0, %cst [2] : vector<2x4x256xf32> to vector<2x4xf32>
    %2 = vector.shape_cast %1 : vector<2x4xf32> to vector<2x4x1xf32>
    %3 = arith.mulf %0, %0 : vector<2x4x256xf32>
    %cst_2 = arith.constant dense<0.000000e+00> : vector<2x4xf32>
    %4 = vector.multi_reduction <add>, %3, %cst_2 [2] : vector<2x4x256xf32> to vector<2x4xf32>
    %5 = vector.shape_cast %4 : vector<2x4xf32> to vector<2x4x1xf32>
    %cst_3 = arith.constant dense<0.000000e+00> : vector<4x1xf32>
    %6 = vector.multi_reduction <add>, %2, %cst_3 [0] : vector<2x4x1xf32> to vector<4x1xf32>
    %7 = vector.shape_cast %6 : vector<4x1xf32> to vector<1x4x1xf32>
    %cst_4 = arith.constant dense<0.000000e+00> : vector<4x1xf32>
    %8 = vector.multi_reduction <add>, %5, %cst_4 [0] : vector<2x4x1xf32> to vector<4x1xf32>
    %9 = vector.shape_cast %8 : vector<4x1xf32> to vector<1x4x1xf32>
    %cst_5 = arith.constant 0.001953125 : f32
    %10 = vector.broadcast %cst_5 : f32 to vector<1x4x1xf32>
    %11 = arith.mulf %7, %10 : vector<1x4x1xf32>
    %cst_6 = arith.constant 0.001953125 : f32
    %12 = vector.broadcast %cst_6 : f32 to vector<1x4x1xf32>
    %13 = arith.mulf %9, %12 : vector<1x4x1xf32>
    %14 = arith.mulf %11, %11 : vector<1x4x1xf32>
    %15 = arith.subf %13, %14 : vector<1x4x1xf32>
    %cst_7 = arith.constant 0.000000e+00 : f32
    %16 = vector.broadcast %cst_7 : f32 to vector<1x4x1xf32>
    %17 = arith.maximumf %15, %16 : vector<1x4x1xf32>
    %cst_8 = arith.constant 9.99999974E-6 : f32
    %18 = vector.broadcast %cst_8 : f32 to vector<1x4x1xf32>
    %19 = arith.addf %17, %18 : vector<1x4x1xf32>
    %20 = math.rsqrt %19 : vector<1x4x1xf32>
    %c0_9 = arith.constant 0 : index
    %c0_10 = arith.constant 0 : index
    %c0_11 = arith.constant 0 : index
    %21 = vector.load %arg3[%c0_9, %c0_10, %c0_11] : memref<2x4x1xf32, #tpu.memory_space<vmem>>, vector<1x4x1xf32>
    %22 = vector.shape_cast %21 : vector<1x4x1xf32> to vector<4x1xf32>
    %23 = vector.shape_cast %22 : vector<4x1xf32> to vector<1x4x1xf32>
    %24 = arith.mulf %20, %23 : vector<1x4x1xf32>
    %c1 = arith.constant 1 : index
    %c0_12 = arith.constant 0 : index
    %c0_13 = arith.constant 0 : index
    %25 = vector.load %arg3[%c1, %c0_12, %c0_13] : memref<2x4x1xf32, #tpu.memory_space<vmem>>, vector<1x4x1xf32>
    %26 = vector.shape_cast %25 : vector<1x4x1xf32> to vector<4x1xf32>
    %27 = arith.mulf %11, %24 : vector<1x4x1xf32>
    %28 = vector.shape_cast %26 : vector<4x1xf32> to vector<1x4x1xf32>
    %29 = arith.subf %28, %27 : vector<1x4x1xf32>
    %30 = vector.broadcast %24 : vector<1x4x1xf32> to vector<2x4x256xf32>
    %31 = arith.mulf %0, %30 : vector<2x4x256xf32>
    %32 = vector.broadcast %29 : vector<1x4x1xf32> to vector<2x4x256xf32>
    %33 = arith.addf %31, %32 : vector<2x4x256xf32>
    %c0_14 = arith.constant 0 : index
    %c0_15 = arith.constant 0 : index
    %c0_16 = arith.constant 0 : index
    %34 = vector.load %arg5[%c0_14, %c0_15, %c0_16] : memref<2x4x256xf32, #tpu.memory_space<vmem>>, vector<2x4x256xf32>
    tpu.vector_store %arg5[%c0_14, %c0_15, %c0_16], %33 {strides = array<i32>} : memref<2x4x256xf32, #tpu.memory_space<vmem>>, vector<2x4x256xf32>,
    %c0_17 = arith.constant 0 : index
    %c0_18 = arith.constant 0 : index
    %c0_19 = arith.constant 0 : index
    %35 = vector.load %arg2[%c0_17, %c0_18, %c0_19] : memref<2x4x256xf32, #tpu.memory_space<vmem>>, vector<2x4x256xf32>
    %cst_20 = arith.constant dense<0.000000e+00> : vector<2x4xf32>
    %36 = vector.multi_reduction <add>, %35, %cst_20 [2] : vector<2x4x256xf32> to vector<2x4xf32>
    %37 = vector.shape_cast %36 : vector<2x4xf32> to vector<2x4x1xf32>
    %38 = arith.mulf %35, %35 : vector<2x4x256xf32>
    %cst_21 = arith.constant dense<0.000000e+00> : vector<2x4xf32>
    %39 = vector.multi_reduction <add>, %38, %cst_21 [2] : vector<2x4x256xf32> to vector<2x4xf32>
    %40 = vector.shape_cast %39 : vector<2x4xf32> to vector<2x4x1xf32>
    %cst_22 = arith.constant dense<0.000000e+00> : vector<4x1xf32>
    %41 = vector.multi_reduction <add>, %37, %cst_22 [0] : vector<2x4x1xf32> to vector<4x1xf32>
    %42 = vector.shape_cast %41 : vector<4x1xf32> to vector<1x4x1xf32>
    %cst_23 = arith.constant dense<0.000000e+00> : vector<4x1xf32>
    %43 = vector.multi_reduction <add>, %40, %cst_23 [0] : vector<2x4x1xf32> to vector<4x1xf32>
    %44 = vector.shape_cast %43 : vector<4x1xf32> to vector<1x4x1xf32>
    %cst_24 = arith.constant 0.001953125 : f32
    %45 = vector.broadcast %cst_24 : f32 to vector<1x4x1xf32>
    %46 = arith.mulf %42, %45 : vector<1x4x1xf32>
    %cst_25 = arith.constant 0.001953125 : f32
    %47 = vector.broadcast %cst_25 : f32 to vector<1x4x1xf32>
    %48 = arith.mulf %44, %47 : vector<1x4x1xf32>
    %49 = arith.mulf %46, %46 : vector<1x4x1xf32>
    %50 = arith.subf %48, %49 : vector<1x4x1xf32>
    %cst_26 = arith.constant 0.000000e+00 : f32
    %51 = vector.broadcast %cst_26 : f32 to vector<1x4x1xf32>
    %52 = arith.maximumf %50, %51 : vector<1x4x1xf32>
    %cst_27 = arith.constant 9.99999974E-6 : f32
    %53 = vector.broadcast %cst_27 : f32 to vector<1x4x1xf32>
    %54 = arith.addf %52, %53 : vector<1x4x1xf32>
    %55 = math.rsqrt %54 : vector<1x4x1xf32>
    %c0_28 = arith.constant 0 : index
    %c0_29 = arith.constant 0 : index
    %c0_30 = arith.constant 0 : index
    %56 = vector.load %arg4[%c0_28, %c0_29, %c0_30] : memref<2x4x1xf32, #tpu.memory_space<vmem>>, vector<1x4x1xf32>
    %57 = vector.shape_cast %56 : vector<1x4x1xf32> to vector<4x1xf32>
    %58 = vector.shape_cast %57 : vector<4x1xf32> to vector<1x4x1xf32>
    %59 = arith.mulf %55, %58 : vector<1x4x1xf32>
    %c1_31 = arith.constant 1 : index
    %c0_32 = arith.constant 0 : index
    %c0_33 = arith.constant 0 : index
    %60 = vector.load %arg4[%c1_31, %c0_32, %c0_33] : memref<2x4x1xf32, #tpu.memory_space<vmem>>, vector<1x4x1xf32>
    %61 = vector.shape_cast %60 : vector<1x4x1xf32> to vector<4x1xf32>
    %62 = arith.mulf %46, %59 : vector<1x4x1xf32>
    %63 = vector.shape_cast %61 : vector<4x1xf32> to vector<1x4x1xf32>
    %64 = arith.subf %63, %62 : vector<1x4x1xf32>
    %65 = vector.broadcast %59 : vector<1x4x1xf32> to vector<2x4x256xf32>
    %66 = arith.mulf %35, %65 : vector<2x4x256xf32>
    %67 = vector.broadcast %64 : vector<1x4x1xf32> to vector<2x4x256xf32>
    %68 = arith.addf %66, %67 : vector<2x4x256xf32>
    %c0_34 = arith.constant 0 : index
    %c0_35 = arith.constant 0 : index
    %c0_36 = arith.constant 0 : index
    %69 = vector.load %arg6[%c0_34, %c0_35, %c0_36] : memref<2x4x256xf32, #tpu.memory_space<vmem>>, vector<2x4x256xf32>
    tpu.vector_store %arg6[%c0_34, %c0_35, %c0_36], %68 {strides = array<i32>} : memref<2x4x256xf32, #tpu.memory_space<vmem>>, vector<2x4x256xf32>,
    return
  }
  func.func @transform_0(%arg0: i32) -> (i32, i32, i32) {
    %c0_i32 = arith.constant 0 : i32
    %c0_i32_0 = arith.constant 0 : i32
    %c0_i32_1 = arith.constant 0 : i32
    return %c0_i32, %arg0, %c0_i32_0 : i32, i32, i32
  }
  func.func @transform_1(%arg0: i32) -> (i32, i32, i32) {
    %c0_i32 = arith.constant 0 : i32
    %c0_i32_0 = arith.constant 0 : i32
    %c0_i32_1 = arith.constant 0 : i32
    return %c0_i32, %arg0, %c0_i32_0 : i32, i32, i32
  }
  func.func @transform_2(%arg0: i32) -> (i32, i32, i32) {
    %c0_i32 = arith.constant 0 : i32
    %c0_i32_0 = arith.constant 0 : i32
    %c0_i32_1 = arith.constant 0 : i32
    return %c0_i32, %arg0, %c0_i32_0 : i32, i32, i32
  }
  func.func @transform_3(%arg0: i32) -> (i32, i32, i32) {
    %c0_i32 = arith.constant 0 : i32
    %c0_i32_0 = arith.constant 0 : i32
    %c0_i32_1 = arith.constant 0 : i32
    return %c0_i32, %arg0, %c0_i32_0 : i32, i32, i32
  }
  func.func @transform_4(%arg0: i32) -> (i32, i32, i32) {
    %c0_i32 = arith.constant 0 : i32
    %c0_i32_0 = arith.constant 0 : i32
    %c0_i32_1 = arith.constant 0 : i32
    return %c0_i32, %arg0, %c0_i32_0 : i32, i32, i32
  }
  func.func @transform_5(%arg0: i32) -> (i32, i32, i32) {
    %c0_i32 = arith.constant 0 : i32
    %c0_i32_0 = arith.constant 0 : i32
    %c0_i32_1 = arith.constant 0 : i32
    return %c0_i32, %arg0, %c0_i32_0 : i32, i32, i32
  }
}

</mosaic_0001>

<bundles_post_ra>
// kernel: tpu_custom_call.1
= control target key start
LH: loop header
LB: loop body
LE: loop exit
PB: predicated region body
PF: predicated region fallthrough
CT: control target
= control target key end

     0   :  { %11 = vsyncpa [#allocation3], 0  ;;  %s494_s0 = inlined_call_operand.vmem [shape: f32[2,4,256], index: 0, kind: input, shape index: {}]   ;;  %s495_s1 = inlined_call_operand.hbm [shape: f32[2,4,256], index: 1, kind: input, shape index: {}]   ;;  %s496_s2 = inlined_call_operand.vmem [shape: f32[2,4,1], index: 2, kind: input, shape index: {}]   ;;  %s497_s3 = inlined_call_operand.vmem [shape: f32[2,4,1], index: 3, kind: input, shape index: {}]   ;;  %s498_s4 = inlined_call_operand.hbm [shape: f32[2,4,256], index: 4, kind: output, shape index: {0}]   ;;  %s499_s5 = inlined_call_operand.hbm [shape: f32[2,4,256], index: 5, kind: output, shape index: {1}]  }
   0x1   :  { %12 = vsyncpa [#allocation4], 0 }
   0x2   :  { %13 = vsyncpa [#allocation7], 0  ;;  %s20_s20 = sshll.u32 %s495_s1, 4  ;;  %s373_s21 = smov [#allocation2]   ;;  %s21_s20 = int_to_ptr.hbm [resolvable:$true] %s20_s20 }
   0x3   :  { %s22_s22 = sshll.u32 %s373_s21, 4  ;;  %s374_s23 = smov 128   ;;  %s23_s22 = int_to_ptr.vmem [resolvable:$true] %s22_s22 }
   0x4   :  { %s375_s24 = smov 8  }
   0x5   :  { %28 = dma.hbm_to_vmem [thread:$0]  %s21_s20, 256, %s23_s22, [#allocation3], %s374_s23, %s374_s23, %s375_s24  }
   0x6   :  { %367 = dma.done.wait [#allocation3], 256  }
   0x7   :  { %368 = vsyncadd [#allocation3], 4294967040  ;;  %v419_v0 = vld [vmem:[%s494_s0] sm:$0xff]  ;;  %v424_v1 = vld [vmem:[%s494_s0 + $0x8] sm:$0xff]  ;;  %vm52_vm0 = vcmask 1043456   ;;  %v376_v56 = vmov 0  }
   0x8   :  { %41 = vst [vmem:[#allocation1] ss:$2 sm:$0xff] %v419_v0  ;;  %v63_v2 = vmul.f32 %v419_v0, %v419_v0  ;;  %v64_v3 = vmul.f32 %v424_v1, %v424_v1  ;;  %v436_v13 = vld [vmem:[#allocation2] sm:$0xff]  ;;  %v438_v14 = vld [vmem:[#allocation2 + $0x8] sm:$0xff]  ;;  %288 = vset.pattern.permute.xlu2 %v376_v56  ;;  %290 = vset.pattern.permute.xlu1 %v376_v56  ;;  %s378_s9 = smov [#allocation5]   ;;  %s379_s13 = smov [#allocation6]  }
   0x9   :  { %45 = vst [vmem:[#allocation1 + $0x10] ss:$2 sm:$0xff] %v424_v1  ;;  %v165_v23 = vmul.f32 %v436_v13, %v436_v13  ;;  %v166_v26 = vmul.f32 %v438_v14, %v438_v14  ;;  %289 = vset.pattern.permute.xlu0 %v376_v56  ;;  %s246_s10 = sshll.u32 %s378_s9, 4  ;;  %s261_s16 = sshll.u32 %s499_s5, 4  ;;  %s247_s10 = int_to_ptr.vmem [resolvable:$true] %s246_s10  ;;  %s262_s16 = int_to_ptr.hbm [resolvable:$true] %s261_s16 }
   0xf   :  { %v42_v4 = vld.sshfl [vmem:[#allocation1] sm:$0xff pattern:$0x75316420]  ;;  %v43_v5 = vld.sshfl [vmem:[#allocation1 + $0x8] sm:$0xff pattern:$0x75316420] }
  0x10   :  { %v53_v6 = vsel %vm52_vm0, %v42_v4, 0.0  ;;  %v54_v7 = vsel %vm52_vm0, %v43_v5, 0.0  ;;  %67 = vst [vmem:[#allocation1] ss:$2 sm:$0xff] %v63_v2 }
  0x11   :  { %v55_v8 = vadd.f32 %v54_v7, %v53_v6  ;;  %v46_v9 = vld.sshfl [vmem:[#allocation1 + $0x10] sm:$0xff pattern:$0x75316420]  ;;  %v47_v10 = vld.sshfl [vmem:[#allocation1 + $0x18] sm:$0xff pattern:$0x75316420] }
  0x12   :  { %71 = vst [vmem:[#allocation1 + $0x10] ss:$2 sm:$0xff] %v64_v3  ;;  %v58_v11 = vsel %vm52_vm0, %v46_v9, 0.0  ;;  %v59_v12 = vsel %vm52_vm0, %v47_v10, 0.0 }
  0x13   :  { %56 = vadd.xlane.f32.xlu0 %v55_v8  ;;  %v60_v17 = vadd.f32 %v59_v12, %v58_v11 }
  0x17   :  { %v68_v15 = vld.sshfl [vmem:[#allocation1] sm:$0xff pattern:$0x75316420]  ;;  %v69_v16 = vld.sshfl [vmem:[#allocation1 + $0x8] sm:$0xff pattern:$0x75316420] }
  0x18   :  { %v78_v18 = vsel %vm52_vm0, %v68_v15, 0.0  ;;  %v79_v19 = vsel %vm52_vm0, %v69_v16, 0.0  ;;  %144 = vst [vmem:[#allocation1] ss:$2 sm:$0xff] %v436_v13 }
  0x19   :  { %v80_v20 = vadd.f32 %v79_v19, %v78_v18  ;;  %v72_v21 = vld.sshfl [vmem:[#allocation1 + $0x10] sm:$0xff pattern:$0x75316420]  ;;  %v73_v22 = vld.sshfl [vmem:[#allocation1 + $0x18] sm:$0xff pattern:$0x75316420] }
  0x1a   :  { %148 = vst [vmem:[#allocation1 + $0x10] ss:$2 sm:$0xff] %v438_v14  ;;  %v83_v24 = vsel %vm52_vm0, %v72_v21, 0.0  ;;  %v84_v25 = vsel %vm52_vm0, %v73_v22, 0.0 }
  0x1b   :  { %81 = vadd.xlane.f32.xlu2 %v80_v20  ;;  %61 = vadd.xlane.f32.xlu0 %v60_v17  ;;  %v85_v29 = vadd.f32 %v84_v25, %v83_v24 }
  0x1f   :  { %v145_v27 = vld.sshfl [vmem:[#allocation1] sm:$0xff pattern:$0x75316420]  ;;  %v146_v28 = vld.sshfl [vmem:[#allocation1 + $0x8] sm:$0xff pattern:$0x75316420] }
  0x20   :  { %v155_v30 = vsel %vm52_vm0, %v145_v27, 0.0  ;;  %v156_v31 = vsel %vm52_vm0, %v146_v28, 0.0  ;;  %169 = vst [vmem:[#allocation1] ss:$2 sm:$0xff] %v165_v23  ;;  %v110_v27 = vld [vmem:[%s496_s2] sm:$0xf] }
  0x21   :  { %v157_v32 = vadd.f32 %v156_v31, %v155_v30  ;;  %v149_v33 = vld.sshfl [vmem:[#allocation1 + $0x10] sm:$0xff pattern:$0x75316420]  ;;  %v150_v34 = vld.sshfl [vmem:[#allocation1 + $0x18] sm:$0xff pattern:$0x75316420] }
  0x22   :  { %173 = vst [vmem:[#allocation1 + $0x10] ss:$2 sm:$0xff] %v166_v26  ;;  %v160_v35 = vsel %vm52_vm0, %v149_v33, 0.0  ;;  %v161_v36 = vsel %vm52_vm0, %v150_v34, 0.0  ;;  %v279_v30 = vld [vmem:[%s496_s2 + $0x4] sm:$0xf] }
  0x23   :  { %158 = vadd.xlane.f32.xlu1 %v157_v32  ;;  %86 = vadd.xlane.f32.xlu2 %v85_v29  ;;  %v162_v37 = vadd.f32 %v161_v36, %v160_v35 }
  0x27   :  { %v170_v38 = vld.sshfl [vmem:[#allocation1] sm:$0xff pattern:$0x75316420]  ;;  %v171_v39 = vld.sshfl [vmem:[#allocation1 + $0x8] sm:$0xff pattern:$0x75316420] }
  0x28   :  { %v180_v40 = vsel %vm52_vm0, %v170_v38, 0.0  ;;  %v181_v41 = vsel %vm52_vm0, %v171_v39, 0.0  ;;  %v212_v39 = vld [vmem:[%s497_s3] sm:$0xf] }
  0x29   :  { %v174_v42 = vld.sshfl [vmem:[#allocation1 + $0x10] sm:$0xff pattern:$0x75316420]  ;;  %v175_v43 = vld.sshfl [vmem:[#allocation1 + $0x18] sm:$0xff pattern:$0x75316420]  ;;  %v182_v44 = vadd.f32 %v181_v41, %v180_v40 }
  0x2a   :  { %v185_v45 = vsel %vm52_vm0, %v174_v42, 0.0  ;;  %v186_v46 = vsel %vm52_vm0, %v175_v43, 0.0  ;;  %v280_v42 = vld [vmem:[%s497_s3 + $0x4] sm:$0xf]  ;;  %s248_s3 = sshll.u32 %s498_s4, 4  ;;  %s259_s4 = sshll.u32 %s379_s13, 4  ;;  %s249_s3 = int_to_ptr.hbm [resolvable:$true] %s248_s3  ;;  %s260_s4 = int_to_ptr.vmem [resolvable:$true] %s259_s4 }
  0x2b   :  { %163 = vadd.xlane.f32.xlu1 %v162_v37  ;;  %183 = vadd.xlane.f32.xlu0 %v182_v44  ;;  %v187_v47 = vadd.f32 %v186_v46, %v185_v45  ;;  %v377_v45 = vmov 839922192  }
  0x2c   :  { %v121_v46 = vunpack.c.l.s4 %v377_v45 }
  0x33   :  { %188 = vadd.xlane.f32.xlu1 %v187_v47  ;;  %v122_v47 = vunpack.c.0.s8 %v121_v46 }
  0x86   :  { %v57_v48 = vpop.xlane.xlu0 %56 }
  0x87   :  { %v88_v49 = vsel %vm52_vm0, %v57_v48, 0.0 }
  0x8e   :  { %v82_v50 = vpop.xlane.xlu2 %81  ;;  %v62_v51 = vpop.xlane.xlu0 %61 }
  0x8f   :  { %v89_v52 = vsel %vm52_vm0, %v62_v51, 0.0  ;;  %v91_v55 = vsel %vm52_vm0, %v82_v50, 0.0 }
  0x90   :  { %v90_v53 = vadd.f32 %v89_v52, %v88_v49 }
  0x92   :  { %v94_v54 = vmul.f32 0.001953125, %v90_v53 }
  0x94   :  { %v96_v60 = vmul.f32 %v94_v54, %v94_v54 }
  0x96   :  { %v159_v57 = vpop.xlane.xlu1 %158  ;;  %v87_v58 = vpop.xlane.xlu2 %86 }
  0x97   :  { %v92_v59 = vsel %vm52_vm0, %v87_v58, 0.0  ;;  %v190_v6 = vsel %vm52_vm0, %v159_v57, 0.0 }
  0x98   :  { %v93_v61 = vadd.f32 %v92_v59, %v91_v55 }
  0x9a   :  { %v95_v62 = vmul.f32 0.001953125, %v93_v61 }
  0x9c   :  { %v97_v63 = vsub.f32 %v95_v62, %v96_v60 }
  0x9e   :  { %v98_v2 = vmax.f32 %v97_v63, 0.0  ;;  %v164_v3 = vpop.xlane.xlu1 %163  ;;  %v184_v8 = vpop.xlane.xlu0 %183 }
  0x9f   :  { %v191_v4 = vsel %vm52_vm0, %v164_v3, 0.0  ;;  %v193_v9 = vsel %vm52_vm0, %v184_v8, 0.0 }
  0xa0   :  { %v99_v5 = vadd.f32 1e-05, %v98_v2  ;;  %v192_v7 = vadd.f32 %v191_v4, %v190_v6 }
  0xa2   :  { %291 = vrsqrt.f32 %v99_v5  ;;  %v196_v10 = vmul.f32 0.001953125, %v192_v7  ;;  %vm106_vm2 = vweird.f32 %v99_v5 }
  0xa4   :  { %v198_v18 = vmul.f32 %v196_v10, %v196_v10 }
  0xa6   :  { %v189_v11 = vpop.xlane.xlu1 %188 }
  0xa7   :  { %v194_v12 = vsel %vm52_vm0, %v189_v11, 0.0 }
  0xa8   :  { %v292_v15 = vpop.eup %291  ;;  %v195_v16 = vadd.f32 %v194_v12, %v193_v9 }
  0xa9   :  { %v101_v17 = vmul.f32 %v292_v15, %v99_v5  ;;  %vm107_vm1 = vweird.f32 %v292_v15 }
  0xaa   :  { %v197_v19 = vmul.f32 0.001953125, %v195_v16  ;;  %vm108_vm3 = vmor %vm106_vm2, %vm107_vm1 }
  0xab   :  { %v102_v20 = vmul.f32 %v292_v15, %v101_v17 }
  0xac   :  { %v199_v21 = vsub.f32 %v197_v19, %v198_v18 }
  0xad   :  { %v103_v22 = vmul.f32 0.5, %v102_v20 }
  0xae   :  { %v200_v23 = vmax.f32 %v199_v21, 0.0 }
  0xaf   :  { %v104_v24 = vsub.f32 1.5, %v103_v22 }
  0xb0   :  { %v201_v25 = vadd.f32 1e-05, %v200_v23 }
  0xb1   :  { %v105_v26 = vmul.f32 %v292_v15, %v104_v24 }
  0xb2   :  { %293 = vrsqrt.f32 %v201_v25  ;;  %vm208_vm5 = vweird.f32 %v201_v25 }
  0xb3   :  { %v109_v28 = vsel %vm108_vm3, %v292_v15, %v105_v26 }
  0xb4   :  { %v111_v29 = vmul.f32 %v110_v27, %v109_v28 }
  0xb6   :  { %118 = vperm.xlu2 %288, %v111_v29   ;;  %v114_v31 = vmul.f32 %v111_v29, %v94_v54 }
  0xb8   :  { %v294_v32 = vpop.eup %293  ;;  %v115_v33 = vsub.f32 %v279_v30, %v114_v31 }
  0xb9   :  { %v203_v34 = vmul.f32 %v294_v32, %v201_v25  ;;  %vm209_vm4 = vweird.f32 %v294_v32 }
  0xba   :  { %129 = vperm.xlu1 %290, %v115_v33   ;;  %vm210_vm6 = vmor %vm208_vm5, %vm209_vm4 }
  0xbb   :  { %v204_v35 = vmul.f32 %v294_v32, %v203_v34 }
  0xbd   :  { %v205_v36 = vmul.f32 0.5, %v204_v35 }
  0xbf   :  { %v206_v37 = vsub.f32 1.5, %v205_v36 }
  0xc1   :  { %v207_v38 = vmul.f32 %v294_v32, %v206_v37 }
  0xc3   :  { %v211_v40 = vsel %vm210_vm6, %v294_v32, %v207_v38 }
  0xc4   :  { %v213_v41 = vmul.f32 %v212_v39, %v211_v40 }
  0xc6   :  { %220 = vperm.xlu0 %289, %v213_v41   ;;  %v216_v43 = vmul.f32 %v213_v41, %v196_v10 }
  0xc8   :  { %v217_v44 = vsub.f32 %v280_v42, %v216_v43 }
  0xca   :  { %231 = vperm.xlu2 %288, %v217_v44  }
 0x110   :  { %v119_v48 = vpop.permute.xlu2 %118 }
 0x111   :  { %v123_v49 = vperm.slane %v119_v48, %v122_v47 }
 0x113   :  { %v125_v51 = vmul.f32 %v123_v49, %v419_v0  ;;  %v126_v52 = vmul.f32 %v123_v49, %v424_v1 }
 0x124   :  { %v232_v0 = vpop.permute.xlu2 %231 }
 0x125   :  { %v236_v57 = vperm.slane %v232_v0, %v122_v47 }
 0x12c   :  { %v130_v50 = vpop.permute.xlu1 %129 }
 0x12d   :  { %v134_v53 = vperm.slane %v130_v50, %v122_v47 }
 0x12f   :  { %v136_v54 = vadd.f32 %v134_v53, %v125_v51  ;;  %v137_v55 = vadd.f32 %v134_v53, %v126_v52 }
 0x131   :  { %138 = vst [vmem:[#allocation5] sm:$0xff] %v136_v54 }
 0x132   :  { %139 = vst [vmem:[#allocation5 + $0x8] sm:$0xff] %v137_v55 }
 0x133   :  { %254 = dma.vmem_to_hbm [thread:$0]  %s247_s10, 256, %s249_s3, [#allocation4], %s374_s23, %s374_s23, %s375_s24  }
 0x138   :  { %v221_v56 = vpop.permute.xlu0 %220 }
 0x139   :  { %v225_v1 = vperm.slane %v221_v56, %v122_v47 }
 0x13b   :  { %v227_v58 = vmul.f32 %v225_v1, %v436_v13  ;;  %v228_v59 = vmul.f32 %v225_v1, %v438_v14 }
 0x13d   :  { %v238_v60 = vadd.f32 %v236_v57, %v227_v58  ;;  %v239_v61 = vadd.f32 %v236_v57, %v228_v59 }
 0x13f   :  { %240 = vst [vmem:[#allocation6] sm:$0xff] %v238_v60 }
 0x140   :  { %241 = vst [vmem:[#allocation6 + $0x8] sm:$0xff] %v239_v61 }
 0x141   :  { %267 = dma.vmem_to_hbm [thread:$0]  %s260_s4, 256, %s262_s16, [#allocation7], %s374_s23, %s374_s23, %s375_s24  }
 0x142   :  { %369 = dma.done.wait [#allocation4], 256  }
 0x143   :  { %370 = vsyncadd [#allocation4], 4294967040 }
 0x144   :  { %371 = dma.done.wait [#allocation7], 256  }
 0x145   :  { %372 = vsyncadd [#allocation7], 4294967040 }
 0x146   :  { %276 = vsyncpa [#allocation3], 1 }
 0x147   :  { %277 = vsyncpa [#allocation4], 1 }
 0x148   :  { %278 = vsyncpa [#allocation7], 1 }

</bundles_post_ra>
